<compile_context>
chip_gen: v6e
topology: v6e:2x2x1
jax: 0.10.0
libtpu: 0.0.40
codegen_flags: <defaults>
</compile_context>

<pallas_src>
import math

import jax
import jax.numpy as jnp
from jax.experimental import pallas as pl
from jax.experimental.pallas import tpu as pltpu


# ----------------------------------------------------------------------------
# Kernels
# ----------------------------------------------------------------------------
def _pe_add_kernel(x_ref, pe_ref, o_ref):
    """Eval-mode kernel: out = x + pe (tiles are [tS, B*D], same dtype)."""
    o_ref[...] = x_ref[...] + pe_ref[...]


def _pe_add_dropout_kernel(x_ref, pe_ref, m_ref, o_ref):
    """Training-mode kernel: out = (x + pe) * mask.

    `mask` already contains 0 for dropped elements and 1/(1-p) for kept ones,
    so the kernel is a single fused add + multiply (pure VPU work, fully
    hidden under the HBM DMA pipeline).
    """
    o_ref[...] = (x_ref[...] + pe_ref[...]) * m_ref[...]


# ----------------------------------------------------------------------------
# PE table (plain JAX, built once — matches the PyTorch buffer)
# ----------------------------------------------------------------------------
def make_positional_encoding_pe(d_model: int, max_len: int = 50) -> jax.Array:
    """Sinusoidal table, shape [max_len, d_model] (f32)."""
    position = jnp.arange(max_len, dtype=jnp.float32)[:, None]          # [L, 1]
    div_term = jnp.exp(
        jnp.arange(0, d_model, 2, dtype=jnp.float32)
        * (-math.log(10000.0) / d_model)
    )                                                                    # [D/2]
    pe = jnp.zeros((max_len, d_model), dtype=jnp.float32)
    pe = pe.at[:, 0::2].set(jnp.sin(position * div_term))
    pe = pe.at[:, 1::2].set(jnp.cos(position * div_term))
    return pe


# ----------------------------------------------------------------------------
# Wrapper
# ----------------------------------------------------------------------------
_TARGET_TILE_BYTES = 2 << 20          # ~2 MiB per x tile (safe on all gens)
_VMEM_LIMIT_BYTES = 32 * 1024 * 1024  # headroom under v7x 64 MiB physical


def _choose_tile_rows(S: int, row_bytes: int) -> int:
    """Rows per sequence tile: multiple of 8 (sublane), ~2 MiB per x tile."""
    rows = max(1, _TARGET_TILE_BYTES // max(1, row_bytes))
    rows = max(8, (rows // 8) * 8)
    if rows >= S:
        return S           # whole array in one (full-extent) block
    return rows


def positional_encoding_forward(
    x: jax.Array,
    pe: jax.Array,
    *,
    dropout_p: float = 0.1,
    training: bool = False,
    seed: int = 0,
) -> jax.Array:
    """x: [seq_len, batch, d_model] -> same shape."""
    S, B, D = x.shape
    BD = B * D

    # Lane-dense 2D view: [S, B, D] -> [S, B*D] (row-major, free reshape).
    x2 = x.reshape(S, BD)
    # pe row per seq position, repeated B times along the fused axis, cast once.
    pe_tiled = jnp.tile(pe[:S].astype(x.dtype), (1, B))                  # [S, B*D]

    row_bytes = BD * jnp.dtype(x.dtype).itemsize
    tS = _choose_tile_rows(S, row_bytes)
    grid = (pl.cdiv(S, tS),)

    compiler_params = pltpu.CompilerParams(
        dimension_semantics=("parallel",),        # v7x: shard tiles over 2 TCs
        vmem_limit_bytes=_VMEM_LIMIT_BYTES,
    )
    out_shape2 = jax.ShapeDtypeStruct((S, BD), x.dtype)
    block = pl.BlockSpec((tS, BD), lambda i: (i, 0))

    if (not training) or dropout_p == 0.0:
        # Eval mode: dropout is identity; pipelined broadcasted add.
        out2 = pl.pallas_call(
            _pe_add_kernel,
            out_shape=out_shape2,
            grid_spec=pl.GridSpec(
                grid=grid,
                in_specs=[block, block],
                out_specs=block,
            ),
            compiler_params=compiler_params,
        )(x2, pe_tiled)
        return out2.reshape(S, B, D)

    # Training mode.
    if dropout_p >= 1.0:
        # Dropout with p=1 zeroes everything (matches torch.nn.Dropout(p=1.0)).
        return jnp.zeros_like(x)

    # Host-generated keep/scale mask (portable; no TPU-only PRNG primitives).
    # mask == 0 for dropped elements, 1/(1-p) for kept ones, in x.dtype.
    p = float(dropout_p)
    scale = 1.0 / (1.0 - p)
    key = jax.random.PRNGKey(seed)
    keep = jax.random.uniform(key, (S, BD), dtype=jnp.float32) >= p
    mask = jnp.where(keep, jnp.float32(scale), jnp.float32(0.0)).astype(x.dtype)

    out2 = pl.pallas_call(
        _pe_add_dropout_kernel,
        out_shape=out_shape2,
        grid_spec=pl.GridSpec(
            grid=grid,
            in_specs=[block, block, block],
            out_specs=block,
        ),
        compiler_params=compiler_params,
    )(x2, pe_tiled, mask)
    return out2.reshape(S, B, D)


# ----------------------------------------------------------------------------
# Self-test
# ----------------------------------------------------------------------------
if __name__ == "__main__":
    # Small shapes consistent with the module's forward: [seq_len, batch, d_model]
    seq_len, batch, d_model = 8, 2, 32
    max_len = 50
    dropout_p = 0.1

    key = jax.random.PRNGKey(0)
    x = jax.random.normal(key, (seq_len, batch, d_model), dtype=jnp.float32)

    pe = make_positional_encoding_pe(d_model, max_len)

    # Eval-mode forward (dropout == identity), deterministic.
    out = positional_encoding_forward(x, pe, dropout_p=dropout_p, training=False)
    out = jax.block_until_ready(out)

    ref = x + pe[:seq_len][:, None, :]
    assert out.shape == (seq_len, batch, d_model)
    assert jnp.allclose(out, ref, atol=1e-6, rtol=1e-6)

    # Training-mode test: dropped elements are exactly 0, kept ones are
    # (x + pe) / (1 - p).
    out_tr = positional_encoding_forward(
        x, pe, dropout_p=dropout_p, training=True, seed=1234
    )
    out_tr = jax.block_until_ready(out_tr)
    assert out_tr.shape == (seq_len, batch, d_model)
    assert bool(jnp.all(jnp.isfinite(out_tr)))
    kept = out_tr != 0.0
    assert bool(
        jnp.allclose(
            jnp.where(kept, out_tr, 0.0),
            jnp.where(kept, ref / (1.0 - dropout_p), 0.0),
            atol=1e-5,
            rtol=1e-5,
        )
    )

    print("KERNEL_OK")
</pallas_src>

<mosaic_0001>
module attributes {stable_mosaic.version = 11 : i64} {
  func.func @_pe_add_kernel(%arg0: i32, %arg1: memref<8x64xf32, #tpu.memory_space<vmem>>, %arg2: memref<8x64xf32, #tpu.memory_space<vmem>>, %arg3: memref<8x64xf32, #tpu.memory_space<vmem>>) attributes {dimension_semantics = [#tpu.dimension_semantics<parallel>], iteration_bounds = array<i64: 1>, scalar_prefetch = 0 : i64, scratch_operands = 0 : i64, tpu.core_type = #tpu.core_type<tc>, window_params = [{transform_indices = @transform_0, window_bounds = array<i64: 8, 64>}, {transform_indices = @transform_1, window_bounds = array<i64: 8, 64>}, {transform_indices = @transform_2, window_bounds = array<i64: 8, 64>}]} {
    %c0 = arith.constant 0 : index
    %c0_0 = arith.constant 0 : index
    %0 = vector.load %arg1[%c0, %c0_0] : memref<8x64xf32, #tpu.memory_space<vmem>>, vector<8x64xf32>
    %c0_1 = arith.constant 0 : index
    %c0_2 = arith.constant 0 : index
    %1 = vector.load %arg2[%c0_1, %c0_2] : memref<8x64xf32, #tpu.memory_space<vmem>>, vector<8x64xf32>
    %2 = arith.addf %0, %1 : vector<8x64xf32>
    %c0_3 = arith.constant 0 : index
    %c0_4 = arith.constant 0 : index
    %3 = vector.load %arg3[%c0_3, %c0_4] : memref<8x64xf32, #tpu.memory_space<vmem>>, vector<8x64xf32>
    tpu.vector_store %arg3[%c0_3, %c0_4], %2 {strides = array<i32>} : memref<8x64xf32, #tpu.memory_space<vmem>>, vector<8x64xf32>,
    return
  }
  func.func @transform_0(%arg0: i32) -> (i32, i32) {
    %c0_i32 = arith.constant 0 : i32
    %c0_i32_0 = arith.constant 0 : i32
    return %arg0, %c0_i32 : i32, i32
  }
  func.func @transform_1(%arg0: i32) -> (i32, i32) {
    %c0_i32 = arith.constant 0 : i32
    %c0_i32_0 = arith.constant 0 : i32
    return %arg0, %c0_i32 : i32, i32
  }
  func.func @transform_2(%arg0: i32) -> (i32, i32) {
    %c0_i32 = arith.constant 0 : i32
    %c0_i32_0 = arith.constant 0 : i32
    return %arg0, %c0_i32 : i32, i32
  }
}

</mosaic_0001>

<bundles_post_ra>
// kernel: tpu_custom_call.1
= control target key start
LH: loop header
LB: loop body
LE: loop exit
PB: predicated region body
PF: predicated region fallthrough
CT: control target
= control target key end

     0   :  { %7 = vsyncpa [#allocation3], 0  ;;  %s153_s0 = inlined_call_operand.hbm [shape: f32[8,64], index: 0, kind: input, shape index: {}]   ;;  %s154_s1 = inlined_call_operand.hbm [shape: f32[8,64], index: 1, kind: input, shape index: {}]   ;;  %s155_s2 = inlined_call_operand.hbm [shape: f32[8,64], index: 2, kind: output, shape index: {}]  }
   0x1   :  { %8 = vsyncpa [#allocation6], 0 }
   0x2   :  { %9 = vsyncpa [#allocation4], 0  ;;  %s126_s9 = smov [#allocation2]   ;;  %s127_s11 = smov [#allocation5]  }
   0x3   :  { %s16_s10 = sshll.u32 %s126_s9, 4  ;;  %s26_s12 = sshll.u32 %s127_s11, 4  ;;  %s17_s10 = int_to_ptr.vmem [resolvable:$true] %s16_s10  ;;  %s27_s12 = int_to_ptr.vmem [resolvable:$true] %s26_s12 }
   0x4   :  { %s68_s13 = scalar_lea.vmem %s17_s10, 128  ;;  %p73_p1 = scmp.lt.s32.totalorder %s17_s10, %s17_s10 }
   0x5   :  { %p69_p0 = scmp.ne.s32.totalorder %s17_s10, %s68_s13  ;;  %p74_p2 = scmp.lt.s32.totalorder %s68_s13, %s68_s13 }
   0x7   :  { %p75_p3 = por %p74_p2, %p73_p1 }
   0x9   :  { %p76_p4 = pnand %p75_p3, %p69_p0 }
   0xb   :  { %79 = shalt.err (!%p76_p4)
}
   0xc   :  { %19 = dma.hbm_to_vmem [thread:$0]  %s153_s0, 128, %s17_s10, [#allocation3]  }
   0xd   :  { %s88_s16 = scalar_lea.vmem %s27_s12, 128  ;;  %p93_p6 = scmp.lt.s32.totalorder %s27_s12, %s27_s12 }
   0xe   :  { %p89_p5 = scmp.ne.s32.totalorder %s27_s12, %s88_s16  ;;  %p94_p7 = scmp.lt.s32.totalorder %s88_s16, %s88_s16 }
  0x10   :  { %p95_p8 = por %p94_p7, %p93_p6 }
  0x12   :  { %p96_p9 = pnand %p95_p8, %p89_p5 }
  0x14   :  { %99 = shalt.err (!%p96_p9)
}
  0x15   :  { %29 = dma.hbm_to_vmem [thread:$0]  %s154_s1, 128, %s27_s12, [#allocation6]  }
  0x16   :  { %120 = dma.done.wait [#allocation3], 128  }
  0x17   :  { %121 = vsyncadd [#allocation3], 4294967168 }
  0x18   :  { %122 = dma.done.wait [#allocation6], 128  }
  0x19   :  { %123 = vsyncadd [#allocation6], 4294967168  ;;  %s128_s19 = smov [#allocation7]   ;;  %v36_v0 = vld [vmem:[#allocation2] sm:$0xff]  ;;  %v37_v1 = vld [vmem:[#allocation5] sm:$0xff]  ;;  %vm39_vm0 = vcmask 523264  }
  0x1a   :  { %s47_s20 = sshll.u32 %s128_s19, 4  ;;  %v38_v2 = vadd.f32 %v37_v1, %v36_v0  ;;  %s48_s20 = int_to_ptr.vmem [resolvable:$true] %s47_s20 }
  0x1b   :  { %s100_s0 = scalar_lea.vmem %s48_s20, 128  ;;  %p105_p11 = scmp.lt.s32.totalorder %s48_s20, %s48_s20 }
  0x1c   :  { %40 = vst.msk [vmem:[#allocation7] sm:$0xff] %vm39_vm0, %v38_v2  ;;  %p101_p10 = scmp.ne.s32.totalorder %s48_s20, %s100_s0  ;;  %p106_p12 = scmp.lt.s32.totalorder %s100_s0, %s100_s0 }
  0x1e   :  { %p107_p13 = por %p106_p12, %p105_p11 }
  0x20   :  { %p108_p0 = pnand %p107_p13, %p101_p10 }
  0x22   :  { %111 = shalt.err (!%p108_p0)
}
  0x23   :  { %50 = dma.vmem_to_hbm [thread:$0]  %s48_s20, 128, %s155_s2, [#allocation4]  }
  0x24   :  { %124 = dma.done.wait [#allocation4], 128  }
  0x25   :  { %125 = vsyncadd [#allocation4], 4294967168 }
  0x26   :  { %54 = vsyncpa [#allocation3], 1 }
  0x27   :  { %55 = vsyncpa [#allocation6], 1 }
  0x28   :  { %56 = vsyncpa [#allocation4], 1 }

</bundles_post_ra>
